<compile_context>
chip_gen: v7x
topology: tpu7x:2x2x1
jax: 0.10.0
libtpu: 0.0.40
codegen_flags: <defaults>
</compile_context>

<pallas_src>
import functools
import math

import numpy as np
import jax
import jax.numpy as jnp
from jax.experimental import pallas as pl
from jax.experimental.pallas import tpu as pltpu


# ----------------------------------------------------------------------------
# In-kernel helpers
# ----------------------------------------------------------------------------
def _ln(x, g, b, eps=1e-5):
    """LayerNorm over the last axis, f32 math. g/b are (1, D)."""
    mu = jnp.mean(x, axis=-1, keepdims=True)
    var = jnp.mean(jnp.square(x - mu), axis=-1, keepdims=True)
    return (x - mu) * jax.lax.rsqrt(var + eps) * g + b


# ----------------------------------------------------------------------------
# Fused transformer STACK kernel
#   grid = (batch, depth); output block (b, 0, 0) is VMEM-resident across the
#   depth axis and carries the residual stream from block d to block d+1.
# ----------------------------------------------------------------------------
def _stack_kernel(x_ref,
                  ln1g_ref, ln1b_ref,
                  wqkv_ref, bqkv_ref,
                  wo_ref, bo_ref,
                  ln2g_ref, ln2b_ref,
                  w1_ref, b1_ref,
                  w2_ref, b2_ref,
                  o_ref, *, num_heads, scale):
    # Seed the resident residual stream with the input at depth 0.
    @pl.when(pl.program_id(1) == 0)
    def _():
        o_ref[0] = x_ref[0]

    x = o_ref[0].astype(jnp.float32)                    # (S, D)
    S, D = x.shape
    Dh = D // num_heads

    # ---- attention branch -------------------------------------------------
    h = _ln(x, ln1g_ref[0], ln1b_ref[0])
    qkv = jnp.dot(h, wqkv_ref[0], preferred_element_type=jnp.float32)
    qkv = qkv + bqkv_ref[0]                             # (S, 3D)
    q = qkv[:, 0:D]
    k = qkv[:, D:2 * D]
    v = qkv[:, 2 * D:3 * D]

    head_outs = []
    for hidx in range(num_heads):                       # static head loop
        lo, hi = hidx * Dh, (hidx + 1) * Dh
        qh, kh, vh = q[:, lo:hi], k[:, lo:hi], v[:, lo:hi]
        # scores = qh @ kh^T (contract last dims, no explicit transpose)
        s = jax.lax.dot_general(qh, kh, (((1,), (1,)), ((), ())),
                                preferred_element_type=jnp.float32) * scale
        m = jnp.max(s, axis=-1, keepdims=True)
        p = jnp.exp(s - m)
        denom = jnp.sum(p, axis=-1, keepdims=True)
        p = p * pl.reciprocal(denom, approx=True)       # EUP divide (free slot)
        head_outs.append(jnp.dot(p, vh, preferred_element_type=jnp.float32))
    attn = jnp.concatenate(head_outs, axis=-1)          # (S, D)

    attn = jnp.dot(attn, wo_ref[0], preferred_element_type=jnp.float32)
    attn = attn + bo_ref[0]
    x = x + attn                                        # residual 1 (in-kernel)

    # ---- MLP branch --------------------------------------------------------
    h2 = _ln(x, ln2g_ref[0], ln2b_ref[0])
    h2 = jnp.dot(h2, w1_ref[0], preferred_element_type=jnp.float32) + b1_ref[0]
    h2 = jax.nn.gelu(h2, approximate=True)
    h2 = jnp.dot(h2, w2_ref[0], preferred_element_type=jnp.float32) + b2_ref[0]

    o_ref[0] = (x + h2).astype(o_ref.dtype)             # residual 2 (in-kernel)


def transformer_stack(x, p, num_heads):
    """Run `depth` fused transformer blocks in a single pallas_call.

    p: dict of stacked params with a leading depth axis.
    """
    B, S, D = x.shape
    depth = p["wqkv"].shape[0]
    F = p["w1"].shape[2]
    scale = 1.0 / math.sqrt(D // num_heads)

    per_depth = lambda shape: pl.BlockSpec((1,) + shape, lambda b, d: (d, 0, 0))

    return pl.pallas_call(
        functools.partial(_stack_kernel, num_heads=num_heads, scale=scale),
        out_shape=jax.ShapeDtypeStruct((B, S, D), jnp.float32),
        grid=(B, depth),
        in_specs=[
            pl.BlockSpec((1, S, D), lambda b, d: (b, 0, 0)),   # x (per-batch)
            per_depth((1, D)),                                 # ln1_g
            per_depth((1, D)),                                 # ln1_b
            per_depth((D, 3 * D)),                             # wqkv
            per_depth((1, 3 * D)),                             # bqkv
            per_depth((D, D)),                                 # wo
            per_depth((1, D)),                                 # bo
            per_depth((1, D)),                                 # ln2_g
            per_depth((1, D)),                                 # ln2_b
            per_depth((D, F)),                                 # w1
            per_depth((1, F)),                                 # b1
            per_depth((F, D)),                                 # w2
            per_depth((1, D)),                                 # b2
        ],
        out_specs=pl.BlockSpec((1, S, D), lambda b, d: (b, 0, 0)),
        compiler_params=pltpu.CompilerParams(
            dimension_semantics=("parallel", "arbitrary"),
            vmem_limit_bytes=32 * 1024 * 1024,
        ),
    )(x, p["ln1_g"], p["ln1_b"], p["wqkv"], p["bqkv"], p["wo"], p["bo"],
      p["ln2_g"], p["ln2_b"], p["w1"], p["b1"], p["w2"], p["b2"])


# ----------------------------------------------------------------------------
# Fused patch projection + positional-embedding add
# ----------------------------------------------------------------------------
def _proj_pos_kernel(x_ref, w_ref, b_ref, pos_ref, o_ref):
    y = jnp.dot(x_ref[0], w_ref[...], preferred_element_type=jnp.float32)
    o_ref[0] = (y + b_ref[...] + pos_ref[0]).astype(o_ref.dtype)


def project_add_pos(x_vis, w, b, pos_vis):
    B, Nv, K = x_vis.shape
    N = w.shape[1]
    return pl.pallas_call(
        _proj_pos_kernel,
        out_shape=jax.ShapeDtypeStruct((B, Nv, N), jnp.float32),
        grid=(B,),
        in_specs=[
            pl.BlockSpec((1, Nv, K), lambda b: (b, 0, 0)),
            pl.BlockSpec((K, N), lambda b: (0, 0)),
            pl.BlockSpec((1, N), lambda b: (0, 0)),
            pl.BlockSpec((1, Nv, N), lambda b: (0, 0, 0)),
        ],
        out_specs=pl.BlockSpec((1, Nv, N), lambda b: (b, 0, 0)),
        compiler_params=pltpu.CompilerParams(dimension_semantics=("parallel",)),
    )(x_vis, w, b, pos_vis)


# ----------------------------------------------------------------------------
# Small fused linear (+bias) kernel — used for encoder_to_decoder & ishannet
# ----------------------------------------------------------------------------
def _linear_kernel(x_ref, w_ref, b_ref, o_ref):
    y = jnp.dot(x_ref[...], w_ref[...], preferred_element_type=jnp.float32)
    o_ref[...] = (y + b_ref[...]).astype(o_ref.dtype)


def linear(x, w, b):
    """x: (..., K) @ w: (K, N) + b: (1, N). Tiny shapes -> one VMEM tile."""
    orig = x.shape
    K = orig[-1]
    N = w.shape[1]
    x2 = x.reshape(-1, K)
    M = x2.shape[0]
    out = pl.pallas_call(
        _linear_kernel,
        out_shape=jax.ShapeDtypeStruct((M, N), jnp.float32),
        grid=(1,),
        in_specs=[
            pl.BlockSpec((M, K), lambda i: (0, 0)),
            pl.BlockSpec((K, N), lambda i: (0, 0)),
            pl.BlockSpec((1, N), lambda i: (0, 0)),
        ],
        out_specs=pl.BlockSpec((M, N), lambda i: (0, 0)),
    )(x2, w, b)
    return out.reshape(orig[:-1] + (N,))


# ----------------------------------------------------------------------------
# Parameter construction (deterministic, synthetic, f32, no per-call casts)
# ----------------------------------------------------------------------------
def _init_linear(key, d_in, d_out):
    w = jax.random.normal(key, (d_in, d_out), jnp.float32) * 0.02
    b = jnp.zeros((1, d_out), jnp.float32)
    return w, b


def _init_block(key, d_model, d_ff):
    ks = jax.random.split(key, 4)
    wqkv, bqkv = _init_linear(ks[0], d_model, 3 * d_model)   # fused Q|K|V
    wo, bo = _init_linear(ks[1], d_model, d_model)
    w1, b1 = _init_linear(ks[2], d_model, d_ff)
    w2, b2 = _init_linear(ks[3], d_ff, d_model)
    return dict(
        ln1_g=jnp.ones((1, d_model), jnp.float32),
        ln1_b=jnp.zeros((1, d_model), jnp.float32),
        ln2_g=jnp.ones((1, d_model), jnp.float32),
        ln2_b=jnp.zeros((1, d_model), jnp.float32),
        wqkv=wqkv, bqkv=bqkv, wo=wo, bo=bo,
        w1=w1, b1=b1, w2=w2, b2=b2,
    )


def _stack_blocks(blocks):
    """Stack per-block param dicts along a leading depth axis."""
    return {k: jnp.stack([blk[k] for blk in blocks], axis=0)
            for k in blocks[0].keys()}


def _sinusoidal_pos_emb(num_patch, dim):
    pos = np.arange(num_patch, dtype=np.float64)[:, None]
    i = np.arange(dim, dtype=np.float64)[None, :]
    angle = pos / np.power(10000.0, (2.0 * (i // 2)) / dim)
    pe = np.where(i % 2 == 0, np.sin(angle), np.cos(angle))
    return jnp.asarray(pe[None], jnp.float32)  # (1, num_patch, dim)


def init_mae_params(key, cfg):
    dim, pd, hff = cfg["dim"], cfg["patch_dim"], cfg["h_feedforward"]
    keys = jax.random.split(key, 3 + cfg["depth_encoder"] + cfg["depth_decoder"])
    proj_w, proj_b = _init_linear(keys[0], pd, dim)
    ish_w, ish_b = _init_linear(keys[1], dim, 2)
    e2d_w, e2d_b = _init_linear(keys[2], dim, pd)
    enc = [_init_block(keys[3 + i], dim, hff) for i in range(cfg["depth_encoder"])]
    dec = [_init_block(keys[3 + cfg["depth_encoder"] + i], pd, hff)
           for i in range(cfg["depth_decoder"])]
    return dict(
        proj_w=proj_w, proj_b=proj_b,
        ish_w=ish_w, ish_b=ish_b,
        e2d_w=e2d_w, e2d_b=e2d_b,
        encoder=_stack_blocks(enc),     # stacked: leading depth axis
        decoder=_stack_blocks(dec),     # stacked: leading depth axis
        cls_token=jnp.zeros((1, 1, dim), jnp.float32),    # nn.Parameter(zeros)
        mask_token=jnp.zeros((1, 1, pd), jnp.float32),    # nn.Parameter(zeros)
        pos=_sinusoidal_pos_emb(cfg["num_patch"], dim),
    )


# ----------------------------------------------------------------------------
# Forward pass (mirrors MaskedAutoEncoder.forward)
# ----------------------------------------------------------------------------
def masked_autoencoder_forward(params, x, mask, num_mask, cfg):
    # mask must be a static/host value (boolean patch mask), as in the reference
    B = x.shape[0]
    dim, pd = cfg["dim"], cfg["patch_dim"]
    mask_np = np.asarray(mask)
    vis_idx = np.nonzero(mask_np == 1)[0]
    msk_idx = np.nonzero(mask_np == 0)[0]

    pos_emb = params["pos"]                               # (1, Np, dim)

    # visible tokens -> projection + positional embedding (fused kernel)
    x_vis = x[:, vis_idx, :]                              # (B, Nv, pd)
    pos_vis = pos_emb[:, vis_idx, :]                      # (1, Nv, dim)
    h = project_add_pos(x_vis, params["proj_w"], params["proj_b"], pos_vis)

    # prepend CLS token (glue, XLA)
    cls = jnp.broadcast_to(params["cls_token"], (B, 1, dim))
    h = jnp.concatenate([cls, h], axis=1)                 # (B, Nv+1, dim)

    # encoder: ONE fused pallas_call for the whole stack
    h = transformer_stack(h, params["encoder"], cfg["head_encoder"])

    ishan_pre = h[:, 0, :]                                # (B, dim)
    h = linear(h, params["e2d_w"], params["e2d_b"])       # (B, Nv+1, pd)

    # decoder positional embeddings (channel 0 broadcast, as in the reference)
    dec_emb = jnp.broadcast_to(pos_emb[:, vis_idx, 0:1], (B, len(vis_idx), pd))
    m_emb = jnp.broadcast_to(pos_emb[:, msk_idx, 0:1], (B, len(msk_idx), pd))
    mask_tok = jnp.broadcast_to(params["mask_token"], m_emb.shape)

    h = h[:, 1:, :]                                       # drop CLS
    h = jnp.concatenate([h + dec_emb, mask_tok + m_emb], axis=1)
    h = h[:, -num_mask:, :]                               # keep last num_mask

    # decoder: ONE fused pallas_call for the whole stack
    h = transformer_stack(h, params["decoder"], cfg["head_decoder"])

    ishan_pre = linear(ishan_pre, params["ish_w"], params["ish_b"])  # (B, 2)
    return h, ishan_pre


# ----------------------------------------------------------------------------
# Main
# ----------------------------------------------------------------------------
if __name__ == "__main__":
    cfg = dict(
        dim=32, h_dim=32, h_feedforward=64,
        head_encoder=4, head_decoder=4,
        depth_encoder=2, depth_decoder=2,
        image_size=16, patch_size=4,
    )
    cfg["num_patch"] = (cfg["image_size"] // cfg["patch_size"]) ** 2          # 16
    cfg["patch_dim"] = 3 * cfg["patch_size"] * cfg["patch_size"]              # 48

    B = 2
    key = jax.random.PRNGKey(0)
    k_param, k_x = jax.random.split(key)

    params = init_mae_params(k_param, cfg)

    # patchified input tokens: (B, num_patch, 3*p*p)
    x = jax.random.normal(k_x, (B, cfg["num_patch"], cfg["patch_dim"]), jnp.float32)

    # deterministic binary mask over patches: first half visible, rest masked
    mask = np.zeros(cfg["num_patch"], dtype=np.int32)
    mask[: cfg["num_patch"] // 2] = 1
    num_mask = int((mask == 0).sum())                     # 8

    recon, ishan_pre = masked_autoencoder_forward(params, x, mask, num_mask, cfg)
    recon = jax.block_until_ready(recon)
    ishan_pre = jax.block_until_ready(ishan_pre)

    assert recon.shape == (B, num_mask, cfg["patch_dim"])
    assert ishan_pre.shape == (B, 2)
    assert np.all(np.isfinite(np.asarray(recon)))
    assert np.all(np.isfinite(np.asarray(ishan_pre)))
    print("KERNEL_OK")
</pallas_src>

<mosaic_0001>
module attributes {stable_mosaic.version = 11 : i64} {
  func.func @_proj_pos_kernel(%arg0: i32, %arg1: memref<1x8x48xf32, #tpu.memory_space<vmem>>, %arg2: memref<48x32xf32, #tpu.memory_space<vmem>>, %arg3: memref<1x32xf32, #tpu.memory_space<vmem>>, %arg4: memref<1x8x32xf32, #tpu.memory_space<vmem>>, %arg5: memref<1x8x32xf32, #tpu.memory_space<vmem>>) attributes {dimension_semantics = [#tpu.dimension_semantics<parallel>], iteration_bounds = array<i64: 2>, scalar_prefetch = 0 : i64, scratch_operands = 0 : i64, tpu.core_type = #tpu.core_type<tc>, window_params = [{transform_indices = @transform_0, window_bounds = array<i64: 1, 8, 48>}, {pipeline_mode = #tpu.pipeline_mode<synchronous>, transform_indices = @transform_1, window_bounds = array<i64: 48, 32>}, {pipeline_mode = #tpu.pipeline_mode<synchronous>, transform_indices = @transform_2, window_bounds = array<i64: 1, 32>}, {pipeline_mode = #tpu.pipeline_mode<synchronous>, transform_indices = @transform_3, window_bounds = array<i64: 1, 8, 32>}, {transform_indices = @transform_4, window_bounds = array<i64: 1, 8, 32>}]} {
    %c0 = arith.constant 0 : index
    %c0_0 = arith.constant 0 : index
    %c0_1 = arith.constant 0 : index
    %0 = vector.load %arg1[%c0, %c0_0, %c0_1] : memref<1x8x48xf32, #tpu.memory_space<vmem>>, vector<1x8x48xf32>
    %1 = vector.shape_cast %0 : vector<1x8x48xf32> to vector<8x48xf32>
    %c0_2 = arith.constant 0 : index
    %c0_3 = arith.constant 0 : index
    %2 = vector.load %arg2[%c0_2, %c0_3] : memref<48x32xf32, #tpu.memory_space<vmem>>, vector<48x32xf32>
    %cst = arith.constant dense<0.000000e+00> : vector<8x32xf32>
    %3 = tpu.matmul %1, %2, %cst {dimension_numbers = #tpu.dot_dimension_numbers<[1], [0], [0], [1], [0, 0, 1, 1], [], []>} : vector<8x48xf32>, vector<48x32xf32>, vector<8x32xf32> -> vector<8x32xf32>
    %c0_4 = arith.constant 0 : index
    %c0_5 = arith.constant 0 : index
    %4 = vector.load %arg3[%c0_4, %c0_5] : memref<1x32xf32, #tpu.memory_space<vmem>>, vector<1x32xf32>
    %5 = vector.broadcast %4 : vector<1x32xf32> to vector<8x32xf32>
    %6 = arith.addf %3, %5 : vector<8x32xf32>
    %c0_6 = arith.constant 0 : index
    %c0_7 = arith.constant 0 : index
    %c0_8 = arith.constant 0 : index
    %7 = vector.load %arg4[%c0_6, %c0_7, %c0_8] : memref<1x8x32xf32, #tpu.memory_space<vmem>>, vector<1x8x32xf32>
    %8 = vector.shape_cast %7 : vector<1x8x32xf32> to vector<8x32xf32>
    %9 = arith.addf %6, %8 : vector<8x32xf32>
    %c0_9 = arith.constant 0 : index
    %c0_10 = arith.constant 0 : index
    %c0_11 = arith.constant 0 : index
    %10 = vector.load %arg5[%c0_9, %c0_10, %c0_11] : memref<1x8x32xf32, #tpu.memory_space<vmem>>, vector<1x8x32xf32>
    %11 = vector.shape_cast %10 : vector<1x8x32xf32> to vector<8x32xf32>
    %12 = vector.shape_cast %9 : vector<8x32xf32> to vector<1x8x32xf32>
    tpu.vector_store %arg5[%c0_9, %c0_10, %c0_11], %12 {strides = array<i32>} : memref<1x8x32xf32, #tpu.memory_space<vmem>>, vector<1x8x32xf32>,
    return
  }
  func.func @transform_0(%arg0: i32) -> (i32, i32, i32) {
    %c0_i32 = arith.constant 0 : i32
    %c0_i32_0 = arith.constant 0 : i32
    %c0_i32_1 = arith.constant 0 : i32
    return %arg0, %c0_i32, %c0_i32_0 : i32, i32, i32
  }
  func.func @transform_1(%arg0: i32) -> (i32, i32) {
    %c0_i32 = arith.constant 0 : i32
    %c0_i32_0 = arith.constant 0 : i32
    %c0_i32_1 = arith.constant 0 : i32
    return %c0_i32, %c0_i32_0 : i32, i32
  }
  func.func @transform_2(%arg0: i32) -> (i32, i32) {
    %c0_i32 = arith.constant 0 : i32
    %c0_i32_0 = arith.constant 0 : i32
    %c0_i32_1 = arith.constant 0 : i32
    return %c0_i32, %c0_i32_0 : i32, i32
  }
  func.func @transform_3(%arg0: i32) -> (i32, i32, i32) {
    %c0_i32 = arith.constant 0 : i32
    %c0_i32_0 = arith.constant 0 : i32
    %c0_i32_1 = arith.constant 0 : i32
    %c0_i32_2 = arith.constant 0 : i32
    return %c0_i32, %c0_i32_0, %c0_i32_1 : i32, i32, i32
  }
  func.func @transform_4(%arg0: i32) -> (i32, i32, i32) {
    %c0_i32 = arith.constant 0 : i32
    %c0_i32_0 = arith.constant 0 : i32
    %c0_i32_1 = arith.constant 0 : i32
    return %arg0, %c0_i32, %c0_i32_0 : i32, i32, i32
  }
}

</mosaic_0001>

<bundles_post_ra>
// kernel: tpu_custom_call.1
= control target key start
LH: loop header
LB: loop body
LE: loop exit
PB: predicated region body
PF: predicated region fallthrough
CT: control target
= control target key end

     0   :  { %9 = vsyncpa [#allocation3], 0  ;;  %s660_s0 = inlined_call_operand.vmem [shape: f32[2,8,48], index: 0, kind: input, shape index: {}]   ;;  %s661_s1 = inlined_call_operand.vmem [shape: f32[48,32], index: 1, kind: input, shape index: {}]   ;;  %s662_s2 = inlined_call_operand.vmem [shape: f32[1,32], index: 2, kind: input, shape index: {}]   ;;  %s663_s3 = inlined_call_operand.vmem [shape: f32[1,8,32], index: 3, kind: input, shape index: {}]   ;;  %s664_s4 = inlined_call_operand.hbm [shape: f32[2,8,32], index: 4, kind: output, shape index: {}]  }
   0x1   :  { %11 = vsyncpa [#allocation3 + $0x1], 0  ;;  %s536_s15 = smov 0   ;;  %s538_s16 = smov 0  }
   0x2   :  { %s540_s17 = smov 0   ;;  %s542_s18 = smov 0  }
   0x3 LB: > { %s557_s19 = sadd.s32 4294967295, %s505_s18   ;;  %s358_s20 = sadd.s32 4294967294, %s505_s18   ;;  %s505_s18 = sphi %s542_s18, %s670_s18   ;;  %s501_s17 = sphi %s540_s17, %s669_s17   ;;  %s497_s16 = sphi %s538_s16, %s668_s16   ;;  %s493_s15 = sphi %s536_s15, %s667_s15  }
   0x4   : > { %s561_s21 = sadd.s32 1, %s505_s18   ;;  %s113_s22 = sadd.s32 1, %s501_s17 }
   0x5   : > { %s110_s23 = ssub.s32 %s505_s18, %s561_s21  ;;  %p123_p0 = scmp.ne.s32.totalorder %s501_s17, %s497_s16 }
   0x6   : > { %p111_p1 = scmp.eq.s32.totalorder %s110_s23, 0  ;;  %p124_p2 = scmp.eq.s32.totalorder %s557_s19, 1 }
   0x7   : > { %p129_p3 = scmp.ne.s32.totalorder %s497_s16, %s493_s15  ;;  %p130_p4 = scmp.eq.s32.totalorder %s358_s20, 1 }
   0x8   : > { %s572_s24 = scalar_select %p111_p1, %s501_s17, %s113_s22  }
   0x9   : > { %p574_p5 = por %p124_p2, %p123_p0  ;;  %p578_p6 = por %p130_p4, %p129_p3 }
   0xa   : > { %p361_p7 = scmp.ge.s32.totalorder %s505_s18, 1  ;;  %p164_p8 = scmp.lt.s32.totalorder %s505_s18, 3 }
   0xc   : > { %p165_p9 = pnand %p361_p7, %p164_p8 }
   0xd   : > { %v194_v0 = vld [vmem:[%s661_s1] sm:$0xff] (!%p165_p9)  ;;  %v195_v1 = vld [vmem:[%s661_s1 + $0x8] sm:$0xff] (!%p165_p9)  ;;  %v196_v2 = vld [vmem:[%s661_s1 + $0x10] sm:$0xff] (!%p165_p9)  ;;  %v507_v3 = vmov (!%p165_p9), 0.0|0.0   ;;  %vm508_vm0 = vmmov (!%p165_p9), 0   ;;  %v509_v6 = vmov (!%p165_p9), 0.0  }
   0xe   : > { %168 = sbr.rel (%p165_p9) target bundleno = 257 (0x101), region = 36  ;;  %392 = vmatprep.subr.bf16.mxu0 (!%p165_p9), %v507_v3  ;;  %v393_v4 = vpack.c.bf16 (!%p165_p9), %v195_v1, %v194_v0  ;;  %v197_v5 = vld [vmem:[%s661_s1 + $0x18] sm:$0xff] (!%p165_p9)  ;;  %389 = vmatprep.mubr.msk.f32.mxu0 (!%p165_p9), %vm508_vm0, %v509_v6  ;;  %p189_p10 = scmp.lt.s32.totalorder (!%p165_p9), %s557_s19, 1  ;;  %v198_v8 = vld [vmem:[%s661_s1 + $0x20] sm:$0xff] (!%p165_p9)  ;;  %v199_v9 = vld [vmem:[%s661_s1 + $0x28] sm:$0xff] (!%p165_p9)  ;;  %vm207_vm1 = vcmask (!%p165_p9), 392192  }
   0xf   : > { %v396_v7 = vpack.c.bf16 (!%p165_p9), %v197_v5, %v196_v2  ;;  %v399_v10 = vpack.c.bf16 (!%p165_p9), %v199_v9, %v198_v8  ;;  %s186_s27 = sand.u32 (!%p165_p9), 1, %s497_s16   ;;  %v364_v12 = vld [vmem:[%s662_s2] ss:$0 sm:$0xff] (!%p165_p9)  ;;  %s367_s7 = sshll.u32 (!%p165_p9), %s557_s19, 7  ;;  %vm283_vm2 = vcmask (!%p165_p9), 261120  }
  0x10   : > { %394 = vmatpush3.bf16.msra.mxu0 (!%p165_p9), %v393_v4  ;;  %s362_s28 = sshll.u32 (!%p165_p9), %s186_s27, 3  ;;  %v281_v14 = vld [vmem:[%s663_s3] sm:$0xff] (!%p165_p9)  ;;  %s618_s12 = scalar_lea.hbm (!%p165_p9), %s664_s4, %s367_s7 }
  0x11   : > { %395 = vmatprep.subr.bf16.mxu0 (!%p165_p9), %v507_v3  ;;  %s188_s8 = scalar_lea.vmem (!%p165_p9), [#allocation2], %s362_s28  ;;  %s286_s13 = scalar_lea.sflag (!%p165_p9), [#allocation3], %s186_s27 }
  0x14   : > { %397 = vmatpush3.bf16.msra.mxu0 (!%p165_p9), %v396_v7 }
  0x15   : > { %s190_s9 = scalar_select %p189_p10, %s557_s19, 1  ;;  %398 = vmatprep.subr.bf16.mxu0 %v507_v3 }
  0x16   : > { %s510_s19 = smov [#allocation2]  }
  0x17   : > { %s363_s14 = sshll.u32 %s190_s9, 3  ;;  %s299_s9 = sshll.u32 %s188_s8, 4  ;;  %s620_s9 = int_to_ptr.vmem [resolvable:$true] %s299_s9 }
  0x18   : > { %s192_s23 = scalar_lea.vmem %s660_s0, %s363_s14  ;;  %400 = vmatpush3.bf16.msra.mxu0 %v399_v10  ;;  %s443_s14 = scalar_lea.vmem %s620_s9, 128 }
  0x19   : > { %v193_v11 = vld [vmem:[%s192_s23] sm:$0xff]  ;;  %p444_p11 = scmp.ne.s32.totalorder %s620_s9, %s443_s14  ;;  %s447_s20 = sshll.u32 %s510_s19, 4  ;;  %s448_s20 = int_to_ptr.vmem [resolvable:$false] %s447_s20 }
  0x1a   : > { %s449_s22 = scalar_lea.vmem %s448_s20, 256  ;;  %p450_p0 = scmp.lt.s32.totalorder %s620_s9, %s448_s20 }
  0x1b   : > { %390 = vmatmul.mubr.msk.f32.vlgmr.msra.gmra.mrb[0].mxu0 %vm207_vm1, %v193_v11  ;;  %p445_p12 = pnand %p444_p11, %p574_p5  ;;  %p451_p1 = scmp.lt.s32.totalorder %s449_s22, %s443_s14 }
  0x1d   : > { %p446_p13 = pneg %p445_p12  ;;  %p452_p2 = por %p451_p1, %p450_p0 }
  0x1f   : > { %p453_p3 = pnand %p452_p2, %p446_p13 }
  0xee   : > { %v277_v13 = vpop.f32.mrb[0].mxu0 }
  0xef   : > { %v278_v15 = vadd.f32 %v364_v12, %v277_v13  ;;  %v391_v16 = vpop.f32.mrb[1].mxu0 }
  0xf1   : > { %v282_v17 = vadd.f32 %v281_v14, %v278_v15 }
  0xf3   : > { %284 = vst.msk [vmem:[%s188_s8] sm:$0xff] %vm283_vm2, %v282_v17 }
  0xf4   : > { %456 = shalt.err (!%p453_p3)
}
  0xf5   : > { %s457_s23 = scalar_lea.hbm %s618_s12, 128  ;;  %s461_s29 = scalar_lea.hbm %s664_s4, 256 }
  0xf6   : > { %p458_p4 = scmp.ne.s32.totalorder %s618_s12, %s457_s23  ;;  %p462_p9 = scmp.lt.u32.totalorder %s618_s12, %s664_s4 }
  0xf7   : > { %p463_p10 = scmp.lt.u32.totalorder %s461_s29, %s457_s23  ;;  %p465_p12 = scmp.lt.u32.totalorder %s457_s23, %s618_s12 }
  0xf8   : > { %p459_p7 = pnand %p458_p4, %p574_p5 }
  0xf9   : > { %p464_p11 = por %p463_p10, %p462_p9 }
  0xfa   : > { %p460_p8 = pneg %p459_p7 }
  0xfb   : > { %p466_p13 = por %p465_p12, %p464_p11 }
  0xfd   : > { %p467_p0 = pnand %p466_p13, %p460_p8 }
  0xff   : > { %470 = shalt.err (!%p467_p0)
}
 0x100   : > { %401 = dma.vmem_to_hbm [thread:$0]  (%p574_p5), %s620_s9, 128, %s618_s12, %s286_s13  }
 0x101 PF: > { %p407_p1 = scmp.ge.s32.totalorder %s505_s18, 2  ;;  %s311_s6 = sand.u32 1, %s493_s15  }
 0x102   : > { %s312_s7 = scalar_lea.sflag [#allocation3], %s311_s6 }
 0x103   : > { %p404_p2 = pnand %p407_p1, %p578_p6 }
 0x105   : > { %488 = dma.done.wait (!%p404_p2), %s312_s7, 128  }
 0x106   : > { %490 = vsyncadd (!%p404_p2), %s312_s7, 4294967168  ;;  %p14_p3 = scmp.ge.s32.totalorder %s561_s21, 4   ;;  %s667_s15 = smov %s497_s16 }
 0x107   : > { %s668_s16 = smov %s501_s17  ;;  %s669_s17 = smov %s572_s24 }
 0x108   : > { %s670_s18 = smov %s561_s21  ;;  %16 = sbr.rel (!%p14_p3) target bundleno = 3 (0x3), region = 71 }
 0x10f   :  { %317 = vsyncpa [#allocation3], 1 }
 0x110   :  { %319 = vsyncpa [#allocation3 + $0x1], 1 }

</bundles_post_ra>
